<compile_context>
chip_gen: v7x
topology: tpu7x:2x2x1
jax: 0.10.0
libtpu: 0.0.40
codegen_flags: <defaults>
</compile_context>

<pallas_src>
from typing import Dict, Tuple

import jax
import jax.numpy as jnp
from jax.experimental import pallas as pl
from jax.experimental.pallas import tpu as pltpu


def _round_up(x: int, m: int) -> int:
    return ((x + m - 1) // m) * m


def _vmem_budget_bytes() -> int:
    """~80% of per-core VMEM (v5e/v6e: 128 MiB, v7x: 64 MiB); conservative fallback."""
    try:
        cap = int(pltpu.get_tpu_info().vmem_capacity_bytes)
        return max(32 * 1024 * 1024, min(int(cap * 0.8), 112 * 1024 * 1024))
    except Exception:
        return 56 * 1024 * 1024


# ----------------------------------------------------------------------------
# Kernel 1: additive-attention pooling, TILE_N sentences per grid step
# ----------------------------------------------------------------------------
def _attention_kernel(x_ref, w_ref, b_ref, u_ref, o_ref):
    # x_ref: (TILE_N, T, D) bf16, w_ref: (D, D) bf16, b_ref/u_ref: (1, D) f32,
    # o_ref: (TILE_N, D) bf16
    tile_n, T, D = x_ref.shape
    x = x_ref[...]                                        # (TILE_N, T, D) bf16
    # One big MXU matmul (M = TILE_N*T rows), bf16 operands, f32 accumulate.
    proj = jnp.tanh(
        jnp.dot(x.reshape(tile_n * T, D), w_ref[...],
                preferred_element_type=jnp.float32) + b_ref[...]
    )                                                     # (TILE_N*T, D) f32
    # Scores via VPU multiply + lane reduce; softmax on a lane-dense (TILE_N, T) layout.
    scores = jnp.sum(
        proj.reshape(tile_n, T, D) * u_ref[...].reshape(1, 1, D), axis=-1
    )                                                     # (TILE_N, T)
    scores = scores - jnp.max(scores, axis=-1, keepdims=True)
    e = jnp.exp(scores)
    alpha = e / jnp.sum(e, axis=-1, keepdims=True)        # (TILE_N, T) f32
    pooled = jnp.sum(alpha[:, :, None] * x.astype(jnp.float32), axis=1)   # (TILE_N, D) f32
    o_ref[...] = pooled.astype(o_ref.dtype)


def attention_pool(x, w, b, u, tile_n=None):
    """x: [N, T, D] bf16 -> [N, D] bf16 (one attention-pooled vector per sentence)."""
    N, T, D = x.shape
    if tile_n is None:
        tile_n = min(64, _round_up(N, 8))   # M = tile_n*T rows per MXU matmul
    n_pad = _round_up(N, tile_n)
    if n_pad != N:
        x = jnp.pad(x, ((0, n_pad - N), (0, 0), (0, 0)))
    out = pl.pallas_call(
        _attention_kernel,
        out_shape=jax.ShapeDtypeStruct((n_pad, D), jnp.bfloat16),
        grid=(n_pad // tile_n,),
        in_specs=[
            pl.BlockSpec((tile_n, T, D), lambda i: (i, 0, 0)),
            pl.BlockSpec((D, D), lambda i: (0, 0)),
            pl.BlockSpec((1, D), lambda i: (0, 0)),
            pl.BlockSpec((1, D), lambda i: (0, 0)),
        ],
        out_specs=pl.BlockSpec((tile_n, D), lambda i: (i, 0)),
        compiler_params=pltpu.CompilerParams(
            dimension_semantics=("parallel",),
            vmem_limit_bytes=_vmem_budget_bytes(),
        ),
    )(x, w, b, u)
    return out[:N]


# ----------------------------------------------------------------------------
# Kernel 2: one bidirectional LSTM layer over a batch of padded sections
#            (time-major, PyTorch gate order i, f, g, o; combined bias b_ih + b_hh)
# ----------------------------------------------------------------------------
def _bilstm_layer_kernel(x_ref, len_ref, wif_ref, whf_ref, bf_ref,
                         wib_ref, whb_ref, bb_ref, o_ref,
                         gxf_ref, gxb_ref):
    # x_ref : (L_max, Bt, Din) bf16      len_ref: (Bt, 1) int32
    # wif/wib: (Din, 4H) bf16            whf/whb: (H, 4H) bf16      bf/bb: (1, 4H) f32
    # o_ref : (L_max, Bt, 2H) {bf16|f32}
    # gx*   : (L_max, Bt, 4H) bf16 scratch (hoisted input projections)
    L_max, Bt, Din = x_ref.shape
    H = whf_ref.shape[0]

    # ---- hoisted input projection: one bf16 MXU matmul per direction, all timesteps ----
    x2 = x_ref[...].reshape(L_max * Bt, Din).astype(jnp.bfloat16)
    gxf_ref[...] = (
        jnp.dot(x2, wif_ref[...], preferred_element_type=jnp.float32) + bf_ref[...]
    ).reshape(L_max, Bt, 4 * H).astype(gxf_ref.dtype)
    gxb_ref[...] = (
        jnp.dot(x2, wib_ref[...], preferred_element_type=jnp.float32) + bb_ref[...]
    ).reshape(L_max, Bt, 4 * H).astype(gxb_ref.dtype)

    lens = len_ref[...]                                   # (Bt, 1) int32

    def act(gates, c):
        i_g = jax.nn.sigmoid(gates[:, 0 * H:1 * H])
        f_g = jax.nn.sigmoid(gates[:, 1 * H:2 * H])
        g_g = jnp.tanh(gates[:, 2 * H:3 * H])
        o_g = jax.nn.sigmoid(gates[:, 3 * H:4 * H])
        c_new = f_g * c + i_g * g_g
        return o_g * jnp.tanh(c_new), c_new

    def step(s, carry):
        h_f, c_f, h_b, c_b = carry
        # ---- forward direction, time index s (padding rows only pollute padding) ----
        gf = gxf_ref[s].astype(jnp.float32) + jnp.dot(
            h_f.astype(jnp.bfloat16), whf_ref[...], preferred_element_type=jnp.float32)
        h_f, c_f = act(gf, c_f)
        o_ref[pl.ds(s, 1), :, 0:H] = h_f[None].astype(o_ref.dtype)
        # ---- backward direction, time index L_max-1-s ----
        t_b = L_max - 1 - s
        gb = gxb_ref[t_b].astype(jnp.float32) + jnp.dot(
            h_b.astype(jnp.bfloat16), whb_ref[...], preferred_element_type=jnp.float32)
        h_b_new, c_b_new = act(gb, c_b)
        o_ref[pl.ds(t_b, 1), :, H:2 * H] = h_b_new[None].astype(o_ref.dtype)
        # packed-sequence semantics: keep the backward carry at zero while still inside a
        # section's right padding so its last real token starts from h0 = c0 = 0.
        valid = t_b < lens                                 # (Bt, 1) bool
        h_b = jnp.where(valid, h_b_new, h_b)
        c_b = jnp.where(valid, c_b_new, c_b)
        return h_f, c_f, h_b, c_b

    z = jnp.zeros((Bt, H), jnp.float32)
    unroll = min(L_max, 8) if Bt <= 16 else 2              # limit vreg pressure at large Bt
    jax.lax.fori_loop(0, L_max, step, (z, z, z, z), unroll=unroll)


def _choose_b_tile(B, L_max, din, H, out_bytes):
    """Largest multiple-of-8 section tile that fits the per-generation VMEM budget."""
    budget = _vmem_budget_bytes()
    cap = _round_up(B, 8)
    best = 8
    for bt in (8, 16, 32, 64, 128, 256):
        if bt > cap:
            break
        x_b = L_max * bt * din * 2 * 3                      # bf16 input, pipelined buffers
        o_b = L_max * bt * 2 * H * out_bytes * 3            # output block, pipelined buffers
        gx_b = 2 * L_max * bt * 4 * H * 2                   # bf16 gate-projection scratch
        w_b = 2 * ((din + H) * 4 * H * 2 + 4 * H * 4) * 2   # both directions, double-buffered
        if x_b + o_b + gx_b + w_b <= int(0.6 * budget):
            best = bt
    # keep >=2 grid steps (v7x: one per TensorCore) whenever the batch allows it
    while best > 8 and _round_up(B, best) // best < 2:
        best //= 2
    return best


def bilstm_layer(x_tm, lengths, w_if, w_hf, b_f, w_ib, w_hb, b_b,
                 b_tile=8, out_dtype=jnp.float32):
    """One BiLSTM layer over right-padded, time-major sections.

    x_tm: [L_max, B_pad, Din] bf16, lengths: [B_pad, 1] int32 -> [L_max, B_pad, 2H] out_dtype.
    """
    L_max, B_pad, Din = x_tm.shape
    H = w_hf.shape[0]
    assert B_pad % b_tile == 0
    return pl.pallas_call(
        _bilstm_layer_kernel,
        out_shape=jax.ShapeDtypeStruct((L_max, B_pad, 2 * H), out_dtype),
        grid=(B_pad // b_tile,),
        in_specs=[
            pl.BlockSpec((L_max, b_tile, Din), lambda b: (0, b, 0)),   # x (time-major, bf16)
            pl.BlockSpec((b_tile, 1), lambda b: (b, 0)),               # lengths
            pl.BlockSpec((Din, 4 * H), lambda b: (0, 0)),              # W_ih fwd (bf16)
            pl.BlockSpec((H, 4 * H), lambda b: (0, 0)),                # W_hh fwd (bf16)
            pl.BlockSpec((1, 4 * H), lambda b: (0, 0)),                # bias fwd (f32)
            pl.BlockSpec((Din, 4 * H), lambda b: (0, 0)),              # W_ih bwd (bf16)
            pl.BlockSpec((H, 4 * H), lambda b: (0, 0)),                # W_hh bwd (bf16)
            pl.BlockSpec((1, 4 * H), lambda b: (0, 0)),                # bias bwd (f32)
        ],
        out_specs=pl.BlockSpec((L_max, b_tile, 2 * H), lambda b: (0, b, 0)),
        scratch_shapes=[
            pltpu.VMEM((L_max, b_tile, 4 * H), jnp.bfloat16),   # gates_x fwd
            pltpu.VMEM((L_max, b_tile, 4 * H), jnp.bfloat16),   # gates_x bwd
        ],
        compiler_params=pltpu.CompilerParams(
            dimension_semantics=("parallel",),   # section blocks shard across TCs on v7x
            vmem_limit_bytes=_vmem_budget_bytes(),
        ),
    )(x_tm, lengths, w_if, w_hf, b_f, w_ib, w_hb, b_b)


# ----------------------------------------------------------------------------
# Parameters + SectionEncoder forward (host glue around the kernels)
# ----------------------------------------------------------------------------
def init_params(key, input_size: int, hidden_size: int, num_layers: int):
    params = {}
    k_att, k_lstm = jax.random.split(key)
    ka, kb, ku = jax.random.split(k_att, 3)
    params["att_w"] = (0.1 * jax.random.normal(ka, (input_size, input_size), jnp.float32)
                       ).astype(jnp.bfloat16)                      # MXU operand -> bf16
    params["att_b"] = 0.1 * jax.random.normal(kb, (1, input_size), jnp.float32)
    params["att_u"] = 0.1 * jax.random.normal(ku, (1, input_size), jnp.float32)

    params["lstm"] = {}
    keys = jax.random.split(k_lstm, num_layers * 2 * 4)
    ki = 0
    for layer in range(num_layers):
        din = input_size if layer == 0 else 2 * hidden_size
        for direction in ("fwd", "bwd"):
            w_ih = 0.1 * jax.random.normal(keys[ki], (4 * hidden_size, din), jnp.float32); ki += 1
            w_hh = 0.1 * jax.random.normal(keys[ki], (4 * hidden_size, hidden_size), jnp.float32); ki += 1
            b_ih = 0.1 * jax.random.normal(keys[ki], (4 * hidden_size,), jnp.float32); ki += 1
            b_hh = 0.1 * jax.random.normal(keys[ki], (4 * hidden_size,), jnp.float32); ki += 1
            params["lstm"][(layer, direction)] = (
                w_ih.T.astype(jnp.bfloat16),              # (din, 4H) bf16, hoisted projection
                w_hh.T.astype(jnp.bfloat16),              # (H, 4H)  bf16, recurrence (f32 acc)
                (b_ih + b_hh).reshape(1, 4 * hidden_size),
            )
    return params


def section_encoder_forward(sentences: Dict[Tuple[int, int], jnp.ndarray], params, num_layers: int):
    keys = sorted(sentences.keys())

    # 1) attention pooling for all sentences in one batched kernel launch (bf16 I/O)
    stacked = jnp.stack([sentences[k] for k in keys], axis=0).astype(jnp.bfloat16)   # [N, T, D]
    pooled = attention_pool(stacked, params["att_w"], params["att_b"], params["att_u"])

    # 2) group sentences into sections (keys sorted -> a section's rows are contiguous)
    sec_ids = sorted({s for (s, _) in keys})
    lengths_list = [sum(1 for (s, _) in keys if s == sid) for sid in sec_ids]
    B = len(sec_ids)
    D = stacked.shape[-1]
    H = params["lstm"][(0, "fwd")][1].shape[0]

    L_pad = _round_up(max(lengths_list), 8)
    b_tile = _choose_b_tile(B, L_pad, max(D, 2 * H), H, 4)
    B_pad = _round_up(B, b_tile)

    # TODO(synk): this per-section pad/stack/transpose could be replaced by scalar-prefetch
    # (PrefetchScalarGridSpec offset/length tables) so the BiLSTM kernel reads pooled [N, D]
    # directly and the padded time-major copy is never materialized in HBM.
    segs, start = [], 0
    for ln in lengths_list:
        segs.append(jnp.pad(pooled[start:start + ln], ((0, L_pad - ln), (0, 0))))
        start += ln
    x_b = jnp.stack(segs, axis=0)                                    # [B, L_pad, D] bf16
    if B_pad != B:
        x_b = jnp.pad(x_b, ((0, B_pad - B), (0, 0), (0, 0)))
    x_tm = jnp.transpose(x_b, (1, 0, 2))                             # [L_pad, B_pad, D] time-major
    lengths = jnp.asarray(lengths_list + [0] * (B_pad - B), jnp.int32).reshape(B_pad, 1)

    # 3) pack -> BiLSTM -> unpack == padded batch + in-kernel length masking (1 launch/layer),
    #    bf16 activations between layers, f32 only for the final layer output.
    h = x_tm
    for layer in range(num_layers):
        w_if, w_hf, b_f = params["lstm"][(layer, "fwd")]
        w_ib, w_hb, b_b = params["lstm"][(layer, "bwd")]
        out_dtype = jnp.float32 if layer == num_layers - 1 else jnp.bfloat16
        h = bilstm_layer(h, lengths, w_if, w_hf, b_f, w_ib, w_hb, b_b,
                         b_tile=b_tile, out_dtype=out_dtype)

    # 4) unpack per section
    return {sid: h[:lengths_list[bi], bi, :] for bi, sid in enumerate(sec_ids)}


# ----------------------------------------------------------------------------
# Pure-JAX f32 reference of the same forward pass (validation only)
# ----------------------------------------------------------------------------
def _ref_lstm_dir(x, w_ih_t, w_hh_t, bias):
    H = w_hh_t.shape[0]
    h = jnp.zeros((H,), jnp.float32)
    c = jnp.zeros((H,), jnp.float32)
    outs = []
    for t in range(x.shape[0]):
        g = x[t] @ w_ih_t + h @ w_hh_t + bias
        i_g = jax.nn.sigmoid(g[0:H])
        f_g = jax.nn.sigmoid(g[H:2 * H])
        g_g = jnp.tanh(g[2 * H:3 * H])
        o_g = jax.nn.sigmoid(g[3 * H:4 * H])
        c = f_g * c + i_g * g_g
        h = o_g * jnp.tanh(c)
        outs.append(h)
    return jnp.stack(outs, axis=0)


def reference_forward(sentences, params, num_layers):
    keys = sorted(sentences.keys())
    W = params["att_w"].astype(jnp.float32)
    b = params["att_b"][0]
    u = params["att_u"][0]
    pooled = {}
    for k in keys:
        x = sentences[k]
        proj = jnp.tanh(x @ W + b)
        alpha = jax.nn.softmax(proj @ u)
        pooled[k] = (alpha[:, None] * x).sum(axis=0)

    secs = {}
    for (s, i) in keys:
        secs.setdefault(s, []).append(pooled[(s, i)])

    out = {}
    for s in sorted(secs):
        h = jnp.stack(secs[s], axis=0)
        for layer in range(num_layers):
            wf_ih, wf_hh, bf = params["lstm"][(layer, "fwd")]
            wb_ih, wb_hh, bb = params["lstm"][(layer, "bwd")]
            hf = _ref_lstm_dir(h, wf_ih.astype(jnp.float32), wf_hh.astype(jnp.float32), bf[0])
            hb = _ref_lstm_dir(h[::-1], wb_ih.astype(jnp.float32), wb_hh.astype(jnp.float32), bb[0])[::-1]
            h = jnp.concatenate([hf, hb], axis=-1)
        out[s] = h
    return out


if __name__ == "__main__":
    INPUT_SIZE = 32    # (module default: 512)
    HIDDEN_SIZE = 16   # (module default: 256)
    NUM_LAYERS = 2
    TOKENS = 8

    key = jax.random.PRNGKey(0)
    k_params, k_data = jax.random.split(key)
    params = init_params(k_params, INPUT_SIZE, HIDDEN_SIZE, NUM_LAYERS)

    # sentences dict: (section_id, sentence_id) -> [TOKENS, INPUT_SIZE]
    sentence_keys = [(0, 0), (0, 1), (0, 2), (1, 0), (1, 1)]
    data_keys = jax.random.split(k_data, len(sentence_keys))
    sentences = {
        sk: jax.random.normal(dk, (TOKENS, INPUT_SIZE), jnp.float32)
        for sk, dk in zip(sentence_keys, data_keys)
    }

    out = section_encoder_forward(sentences, params, NUM_LAYERS)
    ref = reference_forward(sentences, params, NUM_LAYERS)

    for sec in sorted(out.keys()):
        y = jax.block_until_ready(out[sec])
        n_sent = sum(1 for (s, _) in sentence_keys if s == sec)
        assert y.shape == (n_sent, 2 * HIDDEN_SIZE), y.shape
        assert bool(jnp.all(jnp.isfinite(y)))
        # bf16 operands / activations throughout vs f32 reference -> loose tolerance
        assert bool(jnp.allclose(y, ref[sec], atol=5e-2, rtol=5e-2)), (
            "max abs diff", float(jnp.max(jnp.abs(y - ref[sec]))))

    print("KERNEL_OK")
</pallas_src>

<mosaic_0001>
module attributes {stable_mosaic.version = 11 : i64} {
  func.func @_attention_kernel(%arg0: i32, %arg1: memref<8x8x32xbf16, #tpu.memory_space<vmem>>, %arg2: memref<32x32xbf16, #tpu.memory_space<vmem>>, %arg3: memref<1x32xf32, #tpu.memory_space<vmem>>, %arg4: memref<1x32xf32, #tpu.memory_space<vmem>>, %arg5: memref<8x32xbf16, #tpu.memory_space<vmem>>) attributes {dimension_semantics = [#tpu.dimension_semantics<parallel>], iteration_bounds = array<i64: 1>, scalar_prefetch = 0 : i64, scratch_operands = 0 : i64, tpu.core_type = #tpu.core_type<tc>, window_params = [{transform_indices = @transform_0, window_bounds = array<i64: 8, 8, 32>}, {pipeline_mode = #tpu.pipeline_mode<synchronous>, transform_indices = @transform_1, window_bounds = array<i64: 32, 32>}, {pipeline_mode = #tpu.pipeline_mode<synchronous>, transform_indices = @transform_2, window_bounds = array<i64: 1, 32>}, {pipeline_mode = #tpu.pipeline_mode<synchronous>, transform_indices = @transform_3, window_bounds = array<i64: 1, 32>}, {transform_indices = @transform_4, window_bounds = array<i64: 8, 32>}]} {
    %c0 = arith.constant 0 : index
    %c0_0 = arith.constant 0 : index
    %c0_1 = arith.constant 0 : index
    %0 = vector.load %arg1[%c0, %c0_0, %c0_1] : memref<8x8x32xbf16, #tpu.memory_space<vmem>>, vector<8x8x32xbf16>
    %1 = vector.shape_cast %0 : vector<8x8x32xbf16> to vector<64x32xbf16>
    %c0_2 = arith.constant 0 : index
    %c0_3 = arith.constant 0 : index
    %2 = vector.load %arg2[%c0_2, %c0_3] : memref<32x32xbf16, #tpu.memory_space<vmem>>, vector<32x32xbf16>
    %cst = arith.constant dense<0.000000e+00> : vector<64x32xf32>
    %3 = tpu.matmul %1, %2, %cst {dimension_numbers = #tpu.dot_dimension_numbers<[1], [0], [0], [1], [0, 0, 1, 1], [], []>} : vector<64x32xbf16>, vector<32x32xbf16>, vector<64x32xf32> -> vector<64x32xf32>
    %c0_4 = arith.constant 0 : index
    %c0_5 = arith.constant 0 : index
    %4 = vector.load %arg3[%c0_4, %c0_5] : memref<1x32xf32, #tpu.memory_space<vmem>>, vector<1x32xf32>
    %5 = vector.broadcast %4 : vector<1x32xf32> to vector<64x32xf32>
    %6 = arith.addf %3, %5 : vector<64x32xf32>
    %7 = math.tanh %6 : vector<64x32xf32>
    %8 = vector.shape_cast %7 : vector<64x32xf32> to vector<8x8x32xf32>
    %c0_6 = arith.constant 0 : index
    %c0_7 = arith.constant 0 : index
    %9 = vector.load %arg4[%c0_6, %c0_7] : memref<1x32xf32, #tpu.memory_space<vmem>>, vector<1x32xf32>
    %10 = vector.shape_cast %9 : vector<1x32xf32> to vector<1x1x32xf32>
    %11 = vector.broadcast %10 : vector<1x1x32xf32> to vector<8x8x32xf32>
    %12 = arith.mulf %8, %11 : vector<8x8x32xf32>
    %cst_8 = arith.constant dense<0.000000e+00> : vector<8x8xf32>
    %13 = vector.multi_reduction <add>, %12, %cst_8 [2] : vector<8x8x32xf32> to vector<8x8xf32>
    %cst_9 = arith.constant dense<0xFF800000> : vector<8xf32>
    %14 = vector.multi_reduction <maximumf>, %13, %cst_9 [1] : vector<8x8xf32> to vector<8xf32>
    %15 = vector.shape_cast %14 : vector<8xf32> to vector<8x1xf32>
    %16 = vector.broadcast %15 : vector<8x1xf32> to vector<8x8xf32>
    %17 = arith.subf %13, %16 : vector<8x8xf32>
    %18 = math.exp %17 : vector<8x8xf32>
    %cst_10 = arith.constant dense<0.000000e+00> : vector<8xf32>
    %19 = vector.multi_reduction <add>, %18, %cst_10 [1] : vector<8x8xf32> to vector<8xf32>
    %20 = vector.shape_cast %19 : vector<8xf32> to vector<8x1xf32>
    %21 = vector.broadcast %20 : vector<8x1xf32> to vector<8x8xf32>
    %22 = arith.divf %18, %21 : vector<8x8xf32>
    %23 = vector.shape_cast %22 : vector<8x8xf32> to vector<8x8x1xf32>
    %24 = arith.extf %0 : vector<8x8x32xbf16> to vector<8x8x32xf32>
    %25 = vector.broadcast %23 : vector<8x8x1xf32> to vector<8x8x32xf32>
    %26 = arith.mulf %25, %24 : vector<8x8x32xf32>
    %cst_11 = arith.constant dense<0.000000e+00> : vector<8x32xf32>
    %27 = vector.multi_reduction <add>, %26, %cst_11 [1] : vector<8x8x32xf32> to vector<8x32xf32>
    %28 = arith.truncf %27 : vector<8x32xf32> to vector<8x32xbf16>
    %c0_12 = arith.constant 0 : index
    %c0_13 = arith.constant 0 : index
    %29 = vector.load %arg5[%c0_12, %c0_13] : memref<8x32xbf16, #tpu.memory_space<vmem>>, vector<8x32xbf16>
    tpu.vector_store %arg5[%c0_12, %c0_13], %28 {strides = array<i32>} : memref<8x32xbf16, #tpu.memory_space<vmem>>, vector<8x32xbf16>,
    return
  }
  func.func @transform_0(%arg0: i32) -> (i32, i32, i32) {
    %c0_i32 = arith.constant 0 : i32
    %c0_i32_0 = arith.constant 0 : i32
    %c0_i32_1 = arith.constant 0 : i32
    return %arg0, %c0_i32, %c0_i32_0 : i32, i32, i32
  }
  func.func @transform_1(%arg0: i32) -> (i32, i32) {
    %c0_i32 = arith.constant 0 : i32
    %c0_i32_0 = arith.constant 0 : i32
    %c0_i32_1 = arith.constant 0 : i32
    return %c0_i32, %c0_i32_0 : i32, i32
  }
  func.func @transform_2(%arg0: i32) -> (i32, i32) {
    %c0_i32 = arith.constant 0 : i32
    %c0_i32_0 = arith.constant 0 : i32
    %c0_i32_1 = arith.constant 0 : i32
    return %c0_i32, %c0_i32_0 : i32, i32
  }
  func.func @transform_3(%arg0: i32) -> (i32, i32) {
    %c0_i32 = arith.constant 0 : i32
    %c0_i32_0 = arith.constant 0 : i32
    %c0_i32_1 = arith.constant 0 : i32
    return %c0_i32, %c0_i32_0 : i32, i32
  }
  func.func @transform_4(%arg0: i32) -> (i32, i32) {
    %c0_i32 = arith.constant 0 : i32
    %c0_i32_0 = arith.constant 0 : i32
    return %arg0, %c0_i32 : i32, i32
  }
}

</mosaic_0001>

<bundles_post_ra>
// kernel: tpu_custom_call.1
= control target key start
LH: loop header
LB: loop body
LE: loop exit
PB: predicated region body
PF: predicated region fallthrough
CT: control target
= control target key end

     0   :  { %9 = vsyncpa [#allocation3], 0  ;;  %s1077_s0 = inlined_call_operand.hbm [shape: bf16[8,8,32], index: 0, kind: input, shape index: {}]   ;;  %s1078_s1 = inlined_call_operand.hbm [shape: bf16[32,32], index: 1, kind: input, shape index: {}]   ;;  %s1079_s2 = inlined_call_operand.vmem [shape: f32[1,32], index: 2, kind: input, shape index: {}]   ;;  %s1080_s3 = inlined_call_operand.vmem [shape: f32[1,32], index: 3, kind: input, shape index: {}]   ;;  %s1081_s4 = inlined_call_operand.hbm [shape: bf16[8,32], index: 4, kind: output, shape index: {}]  }
   0x1   :  { %10 = vsyncpa [#allocation6], 0 }
   0x2   :  { %11 = vsyncpa [#allocation4], 0  ;;  %s848_s15 = smov [#allocation2]   ;;  %s776_s19 = scalar_lea.hbm %s1077_s0, 512 }
   0x3   :  { %s17_s16 = sshll.u32 %s848_s15, 4  ;;  %p777_p0 = scmp.ne.s32.totalorder %s1077_s0, %s776_s19  ;;  %s18_s16 = int_to_ptr.vmem [resolvable:$true] %s17_s16 }
   0x4   :  { %p780_p1 = scmp.lt.u32.totalorder %s776_s19, %s1077_s0 }
   0x6   :  { %p782_p2 = pnand %p780_p1, %p777_p0 }
   0x8   :  { %785 = shalt.err (!%p782_p2)
}
   0x9   :  { %s786_s24 = scalar_lea.vmem %s18_s16, 512  ;;  %p791_p4 = scmp.lt.s32.totalorder %s18_s16, %s18_s16 }
   0xa   :  { %p787_p3 = scmp.ne.s32.totalorder %s18_s16, %s786_s24  ;;  %p792_p5 = scmp.lt.s32.totalorder %s786_s24, %s786_s24 }
   0xc   :  { %p793_p6 = por %p792_p5, %p791_p4 }
   0xe   :  { %p794_p7 = pnand %p793_p6, %p787_p3 }
  0x10   :  { %797 = shalt.err (!%p794_p7)
}
  0x11   :  { %s849_s25 = smov 64   ;;  %s850_s26 = smov 4  }
  0x12   :  { %23 = dma.hbm_to_vmem [thread:$0]  %s1077_s0, 512, %s18_s16, [#allocation3], %s849_s25, %s849_s25, %s850_s26  }
  0x13   :  { %s851_s29 = smov [#allocation5]   ;;  %s798_s7 = scalar_lea.hbm %s1078_s1, 256 }
  0x14   :  { %s29_s30 = sshll.u32 %s851_s29, 4  ;;  %p799_p8 = scmp.ne.s32.totalorder %s1078_s1, %s798_s7  ;;  %s30_s30 = int_to_ptr.vmem [resolvable:$true] %s29_s30 }
  0x15   :  { %p802_p9 = scmp.lt.u32.totalorder %s798_s7, %s1078_s1 }
  0x17   :  { %p804_p10 = pnand %p802_p9, %p799_p8 }
  0x19   :  { %807 = shalt.err (!%p804_p10)
}
  0x1a   :  { %s808_s12 = scalar_lea.vmem %s30_s30, 256  ;;  %p813_p12 = scmp.lt.s32.totalorder %s30_s30, %s30_s30 }
  0x1b   :  { %p809_p11 = scmp.ne.s32.totalorder %s30_s30, %s808_s12  ;;  %p814_p13 = scmp.lt.s32.totalorder %s808_s12, %s808_s12 }
  0x1d   :  { %p815_p0 = por %p814_p13, %p813_p12 }
  0x1f   :  { %p816_p1 = pnand %p815_p0, %p809_p11 }
  0x21   :  { %819 = shalt.err (!%p816_p1)
}
  0x22   :  { %35 = dma.hbm_to_vmem [thread:$0]  %s1078_s1, 256, %s30_s30, [#allocation6], %s849_s25, %s849_s25, %s850_s26  }
  0x23   :  { %842 = dma.done.wait [#allocation3], 512  }
  0x24   :  { %843 = vsyncadd [#allocation3], 4294966784 }
  0x25   :  { %844 = dma.done.wait [#allocation6], 256  }
  0x26   :  { %845 = vsyncadd [#allocation6], 4294967040  ;;  %v718_v0 = vld [vmem:[#allocation5] sm:$0xff]   ;;  %v719_v1 = vld [vmem:[#allocation5 + $0x8] sm:$0xff]   ;;  %vm98_vm0 = vcmask 261120   ;;  %v231_v48 = vlaneseq  ;;  %vm265_vm1 = vcmask 1041409  }
  0x27   :  { %694 = vmatprep.subr.bf16.mxu0 %v718_v0  ;;  %706 = vmatprep.subr.bf16.mxu1 %v718_v0  ;;  %v903_v2 = vld [vmem:[#allocation2] sm:$0xff]   ;;  %v905_v3 = vld [vmem:[#allocation2 + $0x10] sm:$0xff]   ;;  %v907_v4 = vld [vmem:[#allocation2 + $0x8] sm:$0xff]   ;;  %vm267_vm2 = vcmask 1042434   ;;  %vm269_vm3 = vcmask 1043459   ;;  %vm271_vm4 = vcmask 1044484  }
  0x28   :  { %695 = vmatpush3.bf16.msra.mxu0 %v718_v0  ;;  %708 = vmatpush3.bf16.msra.mxu1 %v718_v0  ;;  %v909_v5 = vld [vmem:[#allocation2 + $0x18] sm:$0xff]   ;;  %v660_v6 = vld [vmem:[%s1079_s2] ss:$0 sm:$0xff]  ;;  %v232_v49 = vand.u32 127, %v231_v48  ;;  %v933_v50 = vshrl.u32 %v231_v48, 7  ;;  %vm273_vm5 = vcmask 1045509  }
  0x29   :  { %696 = vmatprep.subr.bf16.mxu0 %v719_v1  ;;  %707 = vmatprep.subr.bf16.mxu1 %v719_v1  ;;  %v671_v23 = vld [vmem:[%s1080_s3] ss:$0 sm:$0xff]  ;;  %vm275_vm6 = vcmask 1046534   ;;  %vm277_vm7 = vcmask 1047559   ;;  %vm280_vm8 = vcmask 64512   ;;  %s853_s3 = smov [#allocation7]  }
  0x2a   :  { %698 = vmatprep.mubr.msk.bf16.mxu0 %vm98_vm0, %v903_v2  ;;  %702 = vmatprep.mubr.msk.bf16.mxu1 %vm98_vm0, %v905_v3  ;;  %v936_v53 = vsub.s32 %v232_v49, %v933_v50  ;;  %s650_s16 = sshll.u32 %s853_s3, 4  ;;  %vm642_vm9 = vcmask 257024   ;;  %s651_s16 = int_to_ptr.vmem [resolvable:$true] %s650_s16 }
  0x2b   :  { %s820_s17 = scalar_lea.vmem %s651_s16, 64  ;;  %p825_p3 = scmp.lt.s32.totalorder %s651_s16, %s651_s16 }
  0x2c   :  { %697 = vmatpush3.bf16.msra.mxu0 %v719_v1  ;;  %709 = vmatpush3.bf16.msra.mxu1 %v719_v1  ;;  %p821_p2 = scmp.ne.s32.totalorder %s651_s16, %s820_s17  ;;  %p826_p4 = scmp.lt.s32.totalorder %s820_s17, %s820_s17 }
  0x2e   :  { %p827_p5 = por %p826_p4, %p825_p3 }
  0x2f   :  { %699 = vmatmul.mubr.msk.bf16.vlgmr.msra.gmra.mrb[0].mxu0 %vm98_vm0, %v907_v4  ;;  %703 = vmatmul.mubr.msk.bf16.vlgmr.msra.gmra.mrb[0].mxu1 %vm98_vm0, %v909_v5 }
  0x30   :  { %p828_p6 = pnand %p827_p5, %p821_p2 }
 0x102   :  { %v700_v7 = vpop.f32.mrb[0].mxu0  ;;  %v704_v8 = vpop.f32.mrb[0].mxu1 }
 0x103   :  { %v154_v9 = vadd.f32 %v700_v7, %v660_v6  ;;  %v145_v10 = vpop.f32.mrb[1].mxu0  ;;  %v161_v11 = vpop.f32.mrb[1].mxu1  ;;  %v170_v22 = vadd.f32 %v704_v8, %v660_v6 }
 0x104   :  { %v146_v12 = vadd.f32 %v660_v6, %v145_v10  ;;  %v701_v13 = vpop.f32.mrb[2].mxu0  ;;  %v705_v14 = vpop.f32.mrb[2].mxu1  ;;  %v162_v19 = vadd.f32 %v660_v6, %v161_v11 }
 0x105   :  { %728 = vtanh.f32 %v154_v9  ;;  %v157_v15 = vadd.f32 %v701_v13, %v660_v6  ;;  %v148_v16 = vpop.f32.mrb[3].mxu0  ;;  %v164_v17 = vpop.f32.mrb[3].mxu1  ;;  %v173_v21 = vadd.f32 %v705_v14, %v660_v6 }
 0x106   :  { %730 = vtanh.f32 %v146_v12  ;;  %v149_v18 = vadd.f32 %v660_v6, %v148_v16  ;;  %v165_v20 = vadd.f32 %v660_v6, %v164_v17  ;;  %v852_v16 = vmov 0  }
 0x107   :  { %732 = vtanh.f32 %v157_v15  ;;  %717 = vset.pattern.permute.xlu0 %v852_v16  ;;  %716 = vset.pattern.permute.xlu1 %v852_v16  ;;  %v287_v17 = vsub.s32 0, %v933_v50 }
 0x108   :  { %734 = vtanh.f32 %v149_v18  ;;  %v291_v18 = vsub.s32 1, %v933_v50 }
 0x109   :  { %736 = vtanh.f32 %v162_v19  ;;  %v295_v19 = vsub.s32 2, %v933_v50 }
 0x10a   :  { %738 = vtanh.f32 %v165_v20  ;;  %v299_v20 = vsub.s32 3, %v933_v50 }
 0x10b   :  { %740 = vtanh.f32 %v173_v21 }
 0x10c   :  { %742 = vtanh.f32 %v170_v22 }
 0x10f   :  { %v729_v24 = vpop.eup %728 }
 0x110   :  { %v731_v25 = vpop.eup %730  ;;  %v193_v26 = vmul.f32 %v729_v24, %v671_v23 }
 0x111   :  { %v733_v27 = vpop.eup %732  ;;  %v191_v28 = vmul.f32 %v731_v25, %v671_v23  ;;  %v303_v25 = vsub.s32 4, %v933_v50 }
 0x112   :  { %v735_v29 = vpop.eup %734  ;;  %v205_v30 = vsel %vm98_vm0, %v193_v26, 0.0  ;;  %v194_v31 = vmul.f32 %v733_v27, %v671_v23 }
 0x113   :  { %206 = vadd.xlane.f32.xlu1 %v205_v30  ;;  %v199_v32 = vsel %vm98_vm0, %v191_v28, 0.0  ;;  %v192_v33 = vmul.f32 %v735_v29, %v671_v23  ;;  %v737_v34 = vpop.eup %736 }
 0x114   :  { %200 = vadd.xlane.f32.xlu0 %v199_v32  ;;  %v739_v35 = vpop.eup %738  ;;  %v208_v36 = vsel %vm98_vm0, %v194_v31, 0.0  ;;  %v195_v40 = vmul.f32 %v737_v34, %v671_v23  ;;  %v307_v32 = vsub.s32 5, %v933_v50 }
 0x115   :  { %v741_v37 = vpop.eup %740  ;;  %v202_v38 = vsel %vm98_vm0, %v192_v33, 0.0  ;;  %v196_v39 = vmul.f32 %v739_v35, %v671_v23 }
 0x116   :  { %v743_v41 = vpop.eup %742  ;;  %v198_v43 = vmul.f32 %v741_v37, %v671_v23  ;;  %v211_v44 = vsel %vm98_vm0, %v195_v40, 0.0  ;;  %v315_v40 = vsub.s32 7, %v933_v50 }
 0x117   :  { %209 = vadd.xlane.f32.xlu1 %v208_v36  ;;  %v214_v42 = vsel %vm98_vm0, %v196_v39, 0.0  ;;  %v197_v45 = vmul.f32 %v743_v41, %v671_v23  ;;  %v311_v36 = vsub.s32 6, %v933_v50 }
 0x118   :  { %203 = vadd.xlane.f32.xlu0 %v202_v38  ;;  %v220_v46 = vsel %vm98_vm0, %v198_v43, 0.0 }
 0x119   :  { %v217_v47 = vsel %vm98_vm0, %v197_v45, 0.0 }
 0x11b   :  { %215 = vadd.xlane.f32.xlu1 %v214_v42 }
 0x11c   :  { %212 = vadd.xlane.f32.xlu0 %v211_v44 }
 0x11f   :  { %221 = vadd.xlane.f32.xlu1 %v220_v46 }
 0x120   :  { %218 = vadd.xlane.f32.xlu0 %v217_v47 }
 0x1a0   :  { %v207_v51 = vpop.xlane.xlu1 %206 }
 0x1a1   :  { %v201_v52 = vpop.xlane.xlu0 %200  ;;  %v244_v58 = vrot.slane %v207_v51, %v936_v53 }
 0x1a2   :  { %v236_v56 = vrot.slane %v201_v52, %v936_v53 }
 0x1a4   :  { %v210_v54 = vpop.xlane.xlu1 %209 }
 0x1a5   :  { %v204_v55 = vpop.xlane.xlu0 %203  ;;  %v248_v59 = vrot.slane %v210_v54, %v936_v53 }
 0x1a6   :  { %v240_v57 = vrot.slane %v204_v55, %v936_v53 }
 0x1a8   :  { %v266_v60 = vsel %vm265_vm1, %v240_v57, %v236_v56  ;;  %v216_v61 = vpop.xlane.xlu1 %215 }
 0x1a9   :  { %v268_v62 = vsel %vm267_vm2, %v244_v58, %v266_v60  ;;  %v213_v63 = vpop.xlane.xlu0 %212  ;;  %v256_v8 = vrot.slane %v216_v61, %v936_v53 }
 0x1aa   :  { %v270_v0 = vsel %vm269_vm3, %v248_v59, %v268_v62  ;;  %v252_v1 = vrot.slane %v213_v63, %v936_v53 }
 0x1ac   :  { %v272_v6 = vsel %vm271_vm4, %v252_v1, %v270_v0  ;;  %v947_v7 = vpop.xlane.xlu1 %221 }
 0x1ad   :  { %v219_v9 = vpop.xlane.xlu0 %218  ;;  %v264_v11 = vrot.slane %v947_v7, %v936_v53  ;;  %v274_v12 = vsel %vm273_vm5, %v256_v8, %v272_v6 }
 0x1ae   :  { %v260_v10 = vrot.slane %v219_v9, %v936_v53 }
 0x1b0   :  { %v276_v13 = vsel %vm275_vm6, %v260_v10, %v274_v12 }
 0x1b1   :  { %v278_v14 = vsel %vm277_vm7, %v264_v11, %v276_v13 }
 0x1b2   :  { %v281_v15 = vsel %vm280_vm8, %v278_v14, -inf }
 0x1b3   :  { %282 = vmax.xlane.f32.xlu0 %v281_v15 }
 0x240   :  { %v283_v21 = vpop.xlane.xlu0 %282 }
 0x241   :  { %v288_v22 = vrot.slane %v283_v21, %v287_v17  ;;  %v292_v23 = vrot.slane %v283_v21, %v291_v18  ;;  %v296_v24 = vrot.slane %v283_v21, %v295_v19  ;;  %v300_v26 = vrot.slane %v283_v21, %v299_v20 }
 0x242   :  { %v304_v33 = vrot.slane %v283_v21, %v303_v25  ;;  %v308_v37 = vrot.slane %v283_v21, %v307_v32  ;;  %v312_v41 = vrot.slane %v283_v21, %v311_v36  ;;  %v316_v46 = vrot.slane %v283_v21, %v315_v40 }
 0x243   :  { %v325_v27 = vsub.f32 %v201_v52, %v288_v22  ;;  %v326_v28 = vsub.f32 %v204_v55, %v292_v23  ;;  %v327_v29 = vsub.f32 %v207_v51, %v296_v24  ;;  %v328_v34 = vsub.f32 %v210_v54, %v300_v26 }
 0x244   :  { %v329_v38 = vsub.f32 %v213_v63, %v304_v33  ;;  %v330_v42 = vsub.f32 %v216_v61, %v308_v37  ;;  %v331_v47 = vsub.f32 %v219_v9, %v312_v41  ;;  %v332_v51 = vsub.f32 %v947_v7, %v316_v46 }
 0x245   :  { %v333_v30 = vmul.f32 1.442695, %v325_v27  ;;  %v335_v31 = vmul.f32 1.442695, %v326_v28  ;;  %v337_v35 = vmul.f32 1.442695, %v327_v29 }
 0x246   :  { %v339_v39 = vmul.f32 1.442695, %v328_v34  ;;  %v341_v43 = vmul.f32 1.442695, %v329_v38  ;;  %v343_v48 = vmul.f32 1.442695, %v330_v42 }
 0x247   :  { %744 = vpow2.f32 %v333_v30  ;;  %v345_v52 = vmul.f32 1.442695, %v331_v47  ;;  %v347_v55 = vmul.f32 1.442695, %v332_v51 }
 0x248   :  { %746 = vpow2.f32 %v335_v31 }
 0x249   :  { %748 = vpow2.f32 %v337_v35 }
 0x24a   :  { %750 = vpow2.f32 %v339_v39 }
 0x24b   :  { %752 = vpow2.f32 %v341_v43 }
 0x24c   :  { %754 = vpow2.f32 %v343_v48  ;;  %v481_v48 = vunpack.c.l.bf16 %v903_v2 }
 0x24d   :  { %756 = vpow2.f32 %v345_v52 }
 0x24e   :  { %758 = vpow2.f32 %v347_v55  ;;  %v483_v55 = vunpack.c.l.bf16 %v907_v4 }
 0x251   :  { %v745_v44 = vpop.eup %744 }
 0x252   :  { %v979_v45 = vpop.eup %746  ;;  %358 = vperm.xlu1 %716, %v745_v44  }
 0x253   :  { %361 = vperm.xlu0 %717, %v979_v45   ;;  %v984_v49 = vpop.eup %748 }
 0x254   :  { %v988_v54 = vpop.eup %750 }
 0x255   :  { %v991_v56 = vpop.eup %752 }
 0x256   :  { %364 = vperm.xlu1 %716, %v984_v49   ;;  %v994_v57 = vpop.eup %754 }
 0x257   :  { %v997_v58 = vpop.eup %756 }
 0x258   :  { %v1000_v59 = vpop.eup %758 }
 0x25a   :  { %367 = vperm.xlu1 %716, %v988_v54  }
 0x25e   :  { %370 = vperm.xlu1 %716, %v991_v56  }
 0x262   :  { %373 = vperm.xlu1 %716, %v994_v57  }
 0x266   :  { %376 = vperm.xlu1 %716, %v997_v58  }
 0x26a   :  { %379 = vperm.xlu1 %716, %v1000_v59  }
 0x2d1   :  { %v359_v60 = vpop.permute.xlu1 %358 }
 0x2d2   :  { %v362_v0 = vpop.permute.xlu0 %361  ;;  %v384_v7 = vrot.slane %v359_v60, %v936_v53 }
 0x2d3   :  { %v388_v6 = vrot.slane %v362_v0, %v936_v53 }
 0x2d5   :  { %v365_v61 = vpop.permute.xlu1 %364  ;;  %v413_v12 = vsel %vm265_vm1, %v388_v6, %v384_v7  ;;  %v485_v6 = vunpack.c.l.bf16 %v905_v3 }
 0x2d6   :  { %v392_v8 = vrot.slane %v365_v61, %v936_v53  ;;  %v484_v61 = vunpack.c.h.bf16 %v907_v4 }
 0x2d8   :  { %v414_v14 = vsel %vm267_vm2, %v392_v8, %v413_v12 }
 0x2d9   :  { %v368_v62 = vpop.permute.xlu1 %367 }
 0x2da   :  { %v396_v9 = vrot.slane %v368_v62, %v936_v53 }
 0x2dc   :  { %v415_v16 = vsel %vm269_vm3, %v396_v9, %v414_v14  ;;  %v486_v14 = vunpack.c.h.bf16 %v905_v3 }
 0x2dd   :  { %v371_v63 = vpop.permute.xlu1 %370 }
 0x2de   :  { %v400_v10 = vrot.slane %v371_v63, %v936_v53 }
 0x2e0   :  { %v416_v21 = vsel %vm271_vm4, %v400_v10, %v415_v16 }
 0x2e1   :  { %v374_v1 = vpop.permute.xlu1 %373 }
 0x2e2   :  { %v404_v13 = vrot.slane %v374_v1, %v936_v53 }
 0x2e4   :  { %v417_v23 = vsel %vm273_vm5, %v404_v13, %v416_v21 }
 0x2e5   :  { %v377_v11 = vpop.permute.xlu1 %376 }
 0x2e6   :  { %v408_v15 = vrot.slane %v377_v11, %v936_v53 }
 0x2e8   :  { %v418_v26 = vsel %vm275_vm6, %v408_v15, %v417_v23 }
 0x2e9   :  { %v380_v22 = vpop.permute.xlu1 %379 }
 0x2ea   :  { %v412_v24 = vrot.slane %v380_v22, %v936_v53 }
 0x2ec   :  { %v419_v27 = vsel %vm277_vm7, %v412_v24, %v418_v26 }
 0x2ed   :  { %v421_v28 = vsel %vm280_vm8, %v419_v27, 0.0 }
 0x2ee   :  { %422 = vadd.xlane.f32.xlu1 %v421_v28  ;;  %v487_v28 = vunpack.c.l.bf16 %v909_v5 }
 0x37b   :  { %v423_v29 = vpop.xlane.xlu1 %422 }
 0x37c   :  { %v428_v30 = vrot.slane %v423_v29, %v287_v17  ;;  %v432_v31 = vrot.slane %v423_v29, %v291_v18  ;;  %v436_v33 = vrot.slane %v423_v29, %v295_v19  ;;  %v440_v53 = vrot.slane %v423_v29, %v299_v20 }
 0x37d   :  { %v444_v35 = vrot.slane %v423_v29, %v303_v25  ;;  %v448_v17 = vrot.slane %v423_v29, %v307_v32  ;;  %v452_v19 = vrot.slane %v423_v29, %v311_v36  ;;  %v456_v25 = vrot.slane %v423_v29, %v315_v40 }
 0x37e   :  { %760 = vrcp.f32 %v428_v30 }
 0x37f   :  { %762 = vrcp.f32 %v432_v31 }
 0x380   :  { %764 = vrcp.f32 %v436_v33 }
 0x381   :  { %766 = vrcp.f32 %v440_v53 }
 0x382   :  { %768 = vrcp.f32 %v444_v35 }
 0x383   :  { %770 = vrcp.f32 %v448_v17  ;;  %v488_v17 = vunpack.c.h.bf16 %v909_v5 }
 0x384   :  { %772 = vrcp.f32 %v452_v19 }
 0x385   :  { %774 = vrcp.f32 %v456_v25 }
 0x388   :  { %v761_v34 = vpop.eup %760 }
 0x389   :  { %v466_v37 = vmul.f32 %v761_v34, %v745_v44  ;;  %v763_v38 = vpop.eup %762 }
 0x38a   :  { %v468_v18 = vmul.f32 %v763_v38, %v979_v45  ;;  %v765_v39 = vpop.eup %764 }
 0x38b   :  { %491 = vperm.xlu0 %717, %v466_v37   ;;  %v470_v20 = vmul.f32 %v765_v39, %v984_v49  ;;  %v767_v41 = vpop.eup %766  ;;  %v482_v49 = vunpack.c.h.bf16 %v903_v2 }
 0x38c   :  { %v472_v42 = vmul.f32 %v767_v41, %v988_v54  ;;  %v769_v43 = vpop.eup %768 }
 0x38d   :  { %v474_v32 = vmul.f32 %v769_v43, %v991_v56  ;;  %v771_v44 = vpop.eup %770 }
 0x38e   :  { %v476_v45 = vmul.f32 %v771_v44, %v994_v57  ;;  %v773_v36 = vpop.eup %772 }
 0x38f   :  { %496 = vperm.xlu0 %717, %v468_v18   ;;  %v478_v46 = vmul.f32 %v773_v36, %v997_v58  ;;  %v775_v47 = vpop.eup %774 }
 0x390   :  { %v480_v50 = vmul.f32 %v775_v47, %v1000_v59 }
 0x393   :  { %501 = vperm.xlu0 %717, %v470_v20  }
 0x397   :  { %506 = vperm.xlu0 %717, %v472_v42  }
 0x39b   :  { %511 = vperm.xlu0 %717, %v474_v32  }
 0x39f   :  { %516 = vperm.xlu0 %717, %v476_v45  }
 0x3a3   :  { %521 = vperm.xlu0 %717, %v478_v46  }
 0x3a7   :  { %526 = vperm.xlu0 %717, %v480_v50  }
 0x40a   :  { %v492_v40 = vpop.permute.xlu0 %491 }
 0x40b   :  { %v529_v52 = vmul.f32 %v492_v40, %v481_v48 }
 0x40d   :  { %v537_v58 = vsel %vm98_vm0, %v529_v52, 0.0 }
 0x40e   :  { %v497_v51 = vpop.permute.xlu0 %496  ;;  %v538_v63 = vrot.slane %v537_v58, 4 }
 0x40f   :  { %v530_v54 = vmul.f32 %v497_v51, %v482_v49 }
 0x410   :  { %v539_v10 = vadd.f32 %v538_v63, %v537_v58 }
 0x411   :  { %v544_v56 = vsel %vm98_vm0, %v530_v54, 0.0 }
 0x412   :  { %v502_v57 = vpop.permute.xlu0 %501  ;;  %v545_v59 = vrot.slane %v544_v56, 4  ;;  %v540_v22 = vrot.slane %v539_v10, 2 }
 0x413   :  { %v531_v60 = vmul.f32 %v502_v57, %v483_v55 }
 0x414   :  { %v546_v7 = vadd.f32 %v545_v59, %v544_v56  ;;  %v541_v53 = vadd.f32 %v540_v22, %v539_v10 }
 0x415   :  { %v551_v62 = vsel %vm98_vm0, %v531_v60, 0.0 }
 0x416   :  { %v552_v0 = vrot.slane %v551_v62, 4  ;;  %v507_v1 = vpop.permute.xlu0 %506  ;;  %v547_v4 = vrot.slane %v546_v7, 2  ;;  %v542_v25 = vrot.slane %v541_v53, 1 }
 0x417   :  { %v532_v2 = vmul.f32 %v507_v1, %v484_v61 }
 0x418   :  { %v553_v8 = vadd.f32 %v552_v0, %v551_v62  ;;  %v548_v29 = vadd.f32 %v547_v4, %v546_v7  ;;  %v543_v5 = vadd.f32 %v542_v25, %v541_v53 }
 0x419   :  { %v558_v9 = vsel %vm98_vm0, %v532_v2, 0.0 }
 0x41a   :  { %v559_v11 = vrot.slane %v558_v9, 4  ;;  %v512_v12 = vpop.permute.xlu0 %511  ;;  %v554_v16 = vrot.slane %v553_v8, 2  ;;  %v549_v18 = vrot.slane %v548_v29, 1  ;;  %v680_v59 = vpack.c.bf16 %v543_v5, %v543_v5 }
 0x41b   :  { %v533_v13 = vmul.f32 %v512_v12, %v485_v6 }
 0x41c   :  { %v560_v15 = vadd.f32 %v559_v11, %v558_v9  ;;  %v555_v31 = vadd.f32 %v554_v16, %v553_v8  ;;  %v550_v46 = vadd.f32 %v549_v18, %v548_v29  ;;  %v625_v10 = vunpack.c.l.b16 %v680_v59 }
 0x41d   :  { %v565_v21 = vsel %vm98_vm0, %v533_v13, 0.0 }
 0x41e   :  { %v561_v23 = vrot.slane %v560_v15, 2  ;;  %v566_v24 = vrot.slane %v565_v21, 4  ;;  %v517_v26 = vpop.permute.xlu0 %516  ;;  %v556_v19 = vrot.slane %v555_v31, 1  ;;  %v681_v56 = vpack.c.bf16 %v550_v46, %v550_v46 }
 0x41f   :  { %v534_v27 = vmul.f32 %v517_v26, %v486_v14 }
 0x420   :  { %v567_v30 = vadd.f32 %v566_v24, %v565_v21  ;;  %v562_v34 = vadd.f32 %v561_v23, %v560_v15  ;;  %v557_v50 = vadd.f32 %v556_v19, %v555_v31  ;;  %v626_v2 = vunpack.c.l.b16 %v681_v56 }
 0x421   :  { %v572_v33 = vsel %vm98_vm0, %v534_v27, 0.0 }
 0x422   :  { %v568_v3 = vrot.slane %v567_v30, 2  ;;  %v522_v35 = vpop.permute.xlu0 %521  ;;  %v573_v37 = vrot.slane %v572_v33, 4  ;;  %v563_v42 = vrot.slane %v562_v34, 1  ;;  %v682_v60 = vpack.c.bf16 %v557_v50, %v557_v50 }
 0x423   :  { %v535_v38 = vmul.f32 %v522_v35, %v487_v28  ;;  %v633_v4 = vsel %vm265_vm1, %v626_v2, %v625_v10 }
 0x424   :  { %v569_v39 = vadd.f32 %v568_v3, %v567_v30  ;;  %v574_v20 = vadd.f32 %v573_v37, %v572_v33  ;;  %v564_v49 = vadd.f32 %v563_v42, %v562_v34  ;;  %v627_v9 = vunpack.c.l.b16 %v682_v60 }
 0x425   :  { %v579_v41 = vsel %vm98_vm0, %v535_v38, 0.0 }
 0x426   :  { %v580_v43 = vrot.slane %v579_v41, 4  ;;  %v527_v32 = vpop.permute.xlu0 %526  ;;  %v570_v44 = vrot.slane %v569_v39, 1  ;;  %v575_v45 = vrot.slane %v574_v20, 2  ;;  %v683_v62 = vpack.c.bf16 %v564_v49, %v564_v49 }
 0x427   :  { %v536_v36 = vmul.f32 %v527_v32, %v488_v17  ;;  %v634_v21 = vsel %vm267_vm2, %v627_v9, %v633_v4 }
 0x428   :  { %v581_v47 = vadd.f32 %v580_v43, %v579_v41  ;;  %v576_v40 = vadd.f32 %v575_v45, %v574_v20  ;;  %v571_v54 = vadd.f32 %v570_v44, %v569_v39  ;;  %v628_v11 = vunpack.c.l.b16 %v683_v62 }
 0x429   :  { %v586_v48 = vsel %vm98_vm0, %v536_v36, 0.0 }
 0x42a   :  { %v582_v51 = vrot.slane %v581_v47, 2  ;;  %v587_v52 = vrot.slane %v586_v48, 4  ;;  %v577_v55 = vrot.slane %v576_v40, 1  ;;  %v684_v1 = vpack.c.bf16 %v571_v54, %v571_v54 }
 0x42b   :  { %v635_v23 = vsel %vm269_vm3, %v628_v11, %v634_v21 }
 0x42c   :  { %v583_v57 = vadd.f32 %v582_v51, %v581_v47  ;;  %v588_v58 = vadd.f32 %v587_v52, %v586_v48  ;;  %v578_v61 = vadd.f32 %v577_v55, %v576_v40  ;;  %v629_v14 = vunpack.c.l.b16 %v684_v1 }
 0x42e   :  { %v584_v63 = vrot.slane %v583_v57, 1  ;;  %v589_v0 = vrot.slane %v588_v58, 2  ;;  %v685_v6 = vpack.c.bf16 %v578_v61, %v578_v61  ;;  %v636_v26 = vsel %vm271_vm4, %v629_v14, %v635_v23 }
 0x430   :  { %v585_v7 = vadd.f32 %v584_v63, %v583_v57  ;;  %v590_v8 = vadd.f32 %v589_v0, %v588_v58  ;;  %v630_v15 = vunpack.c.l.b16 %v685_v6 }
 0x432   :  { %v686_v12 = vpack.c.bf16 %v585_v7, %v585_v7  ;;  %v591_v13 = vrot.slane %v590_v8, 1  ;;  %v637_v28 = vsel %vm273_vm5, %v630_v15, %v636_v26 }
 0x434   :  { %v592_v16 = vadd.f32 %v591_v13, %v590_v8  ;;  %v631_v22 = vunpack.c.l.b16 %v686_v12 }
 0x436   :  { %v687_v24 = vpack.c.bf16 %v592_v16, %v592_v16  ;;  %v638_v29 = vsel %vm275_vm6, %v631_v22, %v637_v28 }
 0x438   :  { %v632_v27 = vunpack.c.l.b16 %v687_v24 }
 0x43a   :  { %v639_v30 = vsel %vm277_vm7, %v632_v27, %v638_v29 }
 0x43b   :  { %v640_v31 = vpack.c.b16 %v639_v30, %v639_v30 }
 0x43d   :  { %643 = vst.msk [vmem:[#allocation7] sm:$0xf] %vm642_vm9, %v640_v31 }
 0x43e   :  { %831 = shalt.err (!%p828_p6)
}
 0x43f   :  { %s832_s20 = scalar_lea.hbm %s1081_s4, 64 }
 0x440   :  { %p833_p7 = scmp.ne.s32.totalorder %s1081_s4, %s832_s20  ;;  %p836_p8 = scmp.lt.u32.totalorder %s832_s20, %s1081_s4 }
 0x442   :  { %p838_p9 = pnand %p836_p8, %p833_p7 }
 0x444   :  { %841 = shalt.err (!%p838_p9)
}
 0x445   :  { %653 = dma.vmem_to_hbm [thread:$0]  %s651_s16, 64, %s1081_s4, [#allocation4]  }
 0x446   :  { %846 = dma.done.wait [#allocation4], 64  }
 0x447   :  { %847 = vsyncadd [#allocation4], 4294967232 }
 0x448   :  { %657 = vsyncpa [#allocation3], 1 }
 0x449   :  { %658 = vsyncpa [#allocation6], 1 }
 0x44a   :  { %659 = vsyncpa [#allocation4], 1 }

</bundles_post_ra>
